<compile_context>
chip_gen: v5e
topology: v5e:2x2
jax: 0.10.0
libtpu: 0.0.40
codegen_flags: <defaults>
</compile_context>

<pallas_src>
import functools

import jax
import jax.numpy as jnp
from jax import lax
from jax.experimental import pallas as pl
from jax.experimental.pallas import tpu as pltpu

_LANE = 128


def _round_up(x, m):
    return (x + m - 1) // m * m


def _make_kernel(dk_pad, dv_pad, nf, rectify):
    def body(xb, w, fk, fv):
        # xb: (bb, T, dm) bf16;  w: (dm, 2*dk_pad + dv_pad) bf16
        # Projection: one bf16 MXU matmul, f32 accumulation.
        qkv = lax.dot_general(
            xb, w, (((2,), (0,)), ((), ())),
            preferred_element_type=jnp.float32)            # (bb, T, 2dk_pad+dv_pad)
        # Lane-aligned (multiple-of-128) splits -> free views, no lane shuffles.
        q = qkv[:, :, :dk_pad]
        k = qkv[:, :, dk_pad:2 * dk_pad]
        v = qkv[:, :, 2 * dk_pad:]
        if rectify:
            q = jnp.maximum(q, 0.0)
            k = jnp.maximum(k, 0.0)

        # Per-batch self scores; contract the last dims of both operands so no
        # k transpose is materialized.  1/sqrt(dk) is pre-folded into wq.
        s_self = lax.dot_general(
            q, k, (((2,), (2,)), ((0,), (0,))),
            preferred_element_type=jnp.float32)            # (bb, T, T)
        m = jnp.max(s_self, axis=-1, keepdims=True)        # (bb, T, 1)

        if nf > 0:
            # Batch-shared fixed keys (padded columns are zero -> no effect).
            s_fix = lax.dot_general(
                q, fk, (((2,), (1,)), ((), ())),
                preferred_element_type=jnp.float32)        # (bb, T, nf)
            m = jnp.maximum(m, jnp.max(s_fix, axis=-1, keepdims=True))

        p_self = jnp.exp(s_self - m)
        denom = jnp.sum(p_self, axis=-1, keepdims=True)

        # PV contraction in bf16 (f32 accumulation).
        out = lax.dot_general(
            p_self.astype(jnp.bfloat16), v.astype(jnp.bfloat16),
            (((2,), (1,)), ((0,), (0,))),
            preferred_element_type=jnp.float32)            # (bb, T, dv_pad)

        if nf > 0:
            p_fix = jnp.exp(s_fix - m)
            denom = denom + jnp.sum(p_fix, axis=-1, keepdims=True)
            out = out + lax.dot_general(
                p_fix, fv, (((2,), (0,)), ((), ())),
                preferred_element_type=jnp.float32)        # (bb, T, dv_pad)

        # Exact f32 reciprocal of a (bb, T, 1) column: negligible cost, keeps
        # full softmax-normalization accuracy.
        return out * (1.0 / denom)

    if nf > 0:
        def kernel(x_ref, w_ref, fk_ref, fv_ref, o_ref):
            o_ref[...] = body(x_ref[...], w_ref[...],
                              fk_ref[...], fv_ref[...]).astype(o_ref.dtype)
    else:
        def kernel(x_ref, w_ref, o_ref):
            o_ref[...] = body(x_ref[...], w_ref[...], None, None).astype(o_ref.dtype)

    return kernel


@functools.partial(jax.jit, static_argnames=("rectify",))
def self_attention_head(x, wq, wk, wv, fixed_k, fixed_v, *, rectify=False):
    """x: (B, T, dm); wq/wk: (dm, dk); wv: (dm, dv); fixed_k: (nf, dk); fixed_v: (nf, dv)."""
    B, T, dm = x.shape
    dk = wq.shape[1]
    dv = wv.shape[1]
    nf = fixed_k.shape[0]

    dk_pad = _round_up(dk, _LANE)
    dv_pad = _round_up(dv, _LANE)
    cols = 2 * dk_pad + dv_pad
    scale = dk ** (-0.5)                         # module uses k.shape[-1] == dk

    def pad_cols(w, to):
        return jnp.pad(w, ((0, 0), (0, to - w.shape[1])))

    # Fold softmax scale into wq (ReLU commutes with a positive scale); pad each
    # projection block to a 128-lane boundary; cast once (hoisted) to bf16.
    w_qkv = jnp.concatenate(
        [pad_cols(wq.astype(jnp.float32) * scale, dk_pad),
         pad_cols(wk.astype(jnp.float32), dk_pad),
         pad_cols(wv.astype(jnp.float32), dv_pad)], axis=1).astype(jnp.bfloat16)

    x_bf = x.astype(jnp.bfloat16)                # halves x HBM->VMEM traffic

    # --- batch tile size: keep the per-step working set under ~12 MiB so it
    # fits the default scoped-VMEM limit on v5e (16 MiB) and v6e/v7x (32 MiB)
    # without raising vmem_limit_bytes.  (All static Python arithmetic.)
    per_batch = T * (2 * 2 * dm                  # x block, bf16, double-buffered
                     + 2 * 4 * dv_pad            # out block, f32, double-buffered
                     + 2 * 4 * cols              # qkv + q/k/v copies (conservative)
                     + 2 * 4 * T                 # s_self + p_self (f32)
                     + 2 * 4 * max(nf, 1)        # s_fix + p_fix
                     + 4 * dv_pad)               # f32 PV accumulator
    resident = 2 * (2 * dm * cols + 4 * nf * (dk_pad + dv_pad))
    budget = 12 * 1024 * 1024
    bb = max(1, (budget - resident) // max(per_batch, 1))
    bb = min(bb, B)
    if B >= 2:
        bb = min(bb, (B + 1) // 2)               # >=2 grid steps -> both v7x TCs
    grid = (pl.cdiv(B, bb),)

    kernel = _make_kernel(dk_pad, dv_pad, nf, bool(rectify))

    # Trailing block dims equal the full array dims -> no (8,128) alignment
    # requirement even when T is not a multiple of 8 (e.g. ViT T=197).
    x_spec = pl.BlockSpec((bb, T, dm), lambda i: (i, 0, 0))
    w_spec = pl.BlockSpec((dm, cols), lambda i: (0, 0))        # VMEM-resident
    o_spec = pl.BlockSpec((bb, T, dv_pad), lambda i: (i, 0, 0))

    operands = [x_bf, w_qkv]
    in_specs = [x_spec, w_spec]
    if nf > 0:
        fk = jnp.pad(fixed_k.astype(jnp.float32), ((0, 0), (0, dk_pad - dk)))
        fv = jnp.pad(fixed_v.astype(jnp.float32), ((0, 0), (0, dv_pad - dv)))
        operands += [fk, fv]
        in_specs += [pl.BlockSpec((nf, dk_pad), lambda i: (0, 0)),
                     pl.BlockSpec((nf, dv_pad), lambda i: (0, 0))]

    out = pl.pallas_call(
        kernel,
        out_shape=jax.ShapeDtypeStruct((B, T, dv_pad), x.dtype),
        grid=grid,
        in_specs=in_specs,
        out_specs=o_spec,
        compiler_params=pltpu.CompilerParams(
            dimension_semantics=("parallel",)),
    )(*operands)

    return out[:, :, :dv] if dv_pad != dv else out


def _reference(x, wq, wk, wv, fixed_k, fixed_v, rectify=False):
    """Pure-JAX reference replicating the PyTorch forward (eval mode)."""
    B = x.shape[0]
    q = jnp.einsum('btd,dk->btk', x, wq)
    k = jnp.einsum('btd,dk->btk', x, wk)
    if rectify:
        q = jnp.maximum(q, 0.0)
        k = jnp.maximum(k, 0.0)
    v = jnp.einsum('btd,dv->btv', x, wv)
    if fixed_k.shape[0] > 0:
        fk = jnp.broadcast_to(fixed_k[None], (B,) + fixed_k.shape)
        fv = jnp.broadcast_to(fixed_v[None], (B,) + fixed_v.shape)
        k = jnp.concatenate([fk, k], axis=1)
        v = jnp.concatenate([fv, v], axis=1)
    wei = jnp.einsum('btk,bsk->bts', q, k) * (k.shape[-1] ** (-0.5))
    wei = jax.nn.softmax(wei, axis=-1)
    return jnp.einsum('bts,bsv->btv', wei, v)


if __name__ == "__main__":
    # Small shapes consistent with the module: B=2, T=8, dm=32, dk=16, dv=16, nf=4
    B, T, dm, dk, dv, nf = 2, 8, 32, 16, 16, 4

    key = jax.random.PRNGKey(0)
    kx, kq, kk, kv, kf = jax.random.split(key, 5)

    x = jax.random.normal(kx, (B, T, dm), dtype=jnp.float32)
    # nn.Linear(dm, dk, bias=False) weight is (dk, dm); stored transposed (dm, dk).
    wq = jax.random.normal(kq, (dm, dk), dtype=jnp.float32) * (dm ** -0.5)
    wk = jax.random.normal(kk, (dm, dk), dtype=jnp.float32) * (dm ** -0.5)
    wv = jax.random.normal(kv, (dm, dv), dtype=jnp.float32) * (dm ** -0.5)
    fixed_k = jax.random.normal(kf, (nf, dk), dtype=jnp.float32)   # torch.randn
    fixed_v = jnp.zeros((nf, dv), dtype=jnp.float32)               # torch.zeros

    out = self_attention_head(x, wq, wk, wv, fixed_k, fixed_v)
    out = jax.block_until_ready(out)

    ref = _reference(x, wq, wk, wv, fixed_k, fixed_v)
    assert out.shape == (B, T, dv), out.shape
    # Tolerance reflects the bf16 MXU feed (projection + PV matmuls with f32
    # accumulation); softmax math and normalization are exact f32.
    err = float(jnp.max(jnp.abs(out - ref)))
    assert jnp.allclose(out, ref, atol=5e-2, rtol=5e-2), err

    print("KERNEL_OK")
</pallas_src>

<mosaic_0001>
module attributes {stable_mosaic.version = 11 : i64} {
  func.func @kernel(%arg0: i32, %arg1: memref<1x8x32xbf16, #tpu.memory_space<vmem>>, %arg2: memref<32x384xbf16, #tpu.memory_space<vmem>>, %arg3: memref<4x128xf32, #tpu.memory_space<vmem>>, %arg4: memref<4x128xf32, #tpu.memory_space<vmem>>, %arg5: memref<1x8x128xf32, #tpu.memory_space<vmem>>) attributes {dimension_semantics = [#tpu.dimension_semantics<parallel>], iteration_bounds = array<i64: 2>, scalar_prefetch = 0 : i64, scratch_operands = 0 : i64, tpu.core_type = #tpu.core_type<tc>, window_params = [{transform_indices = @transform_0, window_bounds = array<i64: 1, 8, 32>}, {pipeline_mode = #tpu.pipeline_mode<synchronous>, transform_indices = @transform_1, window_bounds = array<i64: 32, 384>}, {pipeline_mode = #tpu.pipeline_mode<synchronous>, transform_indices = @transform_2, window_bounds = array<i64: 4, 128>}, {pipeline_mode = #tpu.pipeline_mode<synchronous>, transform_indices = @transform_3, window_bounds = array<i64: 4, 128>}, {transform_indices = @transform_4, window_bounds = array<i64: 1, 8, 128>}]} {
    %c0 = arith.constant 0 : index
    %c0_0 = arith.constant 0 : index
    %c0_1 = arith.constant 0 : index
    %0 = vector.load %arg1[%c0, %c0_0, %c0_1] : memref<1x8x32xbf16, #tpu.memory_space<vmem>>, vector<1x8x32xbf16>
    %c0_2 = arith.constant 0 : index
    %c0_3 = arith.constant 0 : index
    %1 = vector.load %arg2[%c0_2, %c0_3] : memref<32x384xbf16, #tpu.memory_space<vmem>>, vector<32x384xbf16>
    %c0_4 = arith.constant 0 : index
    %c0_5 = arith.constant 0 : index
    %2 = vector.load %arg3[%c0_4, %c0_5] : memref<4x128xf32, #tpu.memory_space<vmem>>, vector<4x128xf32>
    %c0_6 = arith.constant 0 : index
    %c0_7 = arith.constant 0 : index
    %3 = vector.load %arg4[%c0_6, %c0_7] : memref<4x128xf32, #tpu.memory_space<vmem>>, vector<4x128xf32>
    %cst = arith.constant dense<0.000000e+00> : vector<1x8x384xf32>
    %4 = tpu.matmul %0, %1, %cst {dimension_numbers = #tpu.dot_dimension_numbers<[2], [0], [0, 1], [1], [0, 0, 0, 1, 1, 1], [], []>} : vector<1x8x32xbf16>, vector<32x384xbf16>, vector<1x8x384xf32> -> vector<1x8x384xf32>
    %5 = vector.extract_strided_slice %4 {offsets = [0, 0, 0], sizes = [1, 8, 128], strides = [1, 1, 1]} : vector<1x8x384xf32> to vector<1x8x128xf32>
    %6 = vector.extract_strided_slice %4 {offsets = [0, 0, 128], sizes = [1, 8, 128], strides = [1, 1, 1]} : vector<1x8x384xf32> to vector<1x8x128xf32>
    %7 = vector.extract_strided_slice %4 {offsets = [0, 0, 256], sizes = [1, 8, 128], strides = [1, 1, 1]} : vector<1x8x384xf32> to vector<1x8x128xf32>
    %cst_8 = arith.constant dense<0.000000e+00> : vector<1x8x8xf32>
    %8 = tpu.matmul %5, %6, %cst_8 {dimension_numbers = #tpu.dot_dimension_numbers<[2], [2], [1], [1], [0, 0, 0, 1, 1, 1], [0], [0]>} : vector<1x8x128xf32>, vector<1x8x128xf32>, vector<1x8x8xf32> -> vector<1x8x8xf32>
    %cst_9 = arith.constant dense<0xFF800000> : vector<1x8xf32>
    %9 = vector.multi_reduction <maximumf>, %8, %cst_9 [2] : vector<1x8x8xf32> to vector<1x8xf32>
    %10 = vector.shape_cast %9 : vector<1x8xf32> to vector<1x8x1xf32>
    %cst_10 = arith.constant dense<0.000000e+00> : vector<1x8x4xf32>
    %11 = tpu.matmul %5, %2, %cst_10 {dimension_numbers = #tpu.dot_dimension_numbers<[2], [1], [0, 1], [0], [0, 0, 0, 1, 1, 0], [], []>} : vector<1x8x128xf32>, vector<4x128xf32>, vector<1x8x4xf32> -> vector<1x8x4xf32>
    %cst_11 = arith.constant dense<0xFF800000> : vector<1x8xf32>
    %12 = vector.multi_reduction <maximumf>, %11, %cst_11 [2] : vector<1x8x4xf32> to vector<1x8xf32>
    %13 = vector.shape_cast %12 : vector<1x8xf32> to vector<1x8x1xf32>
    %14 = arith.maximumf %10, %13 : vector<1x8x1xf32>
    %15 = vector.broadcast %14 : vector<1x8x1xf32> to vector<1x8x8xf32>
    %16 = arith.subf %8, %15 : vector<1x8x8xf32>
    %17 = math.exp %16 : vector<1x8x8xf32>
    %cst_12 = arith.constant dense<0.000000e+00> : vector<1x8xf32>
    %18 = vector.multi_reduction <add>, %17, %cst_12 [2] : vector<1x8x8xf32> to vector<1x8xf32>
    %19 = vector.shape_cast %18 : vector<1x8xf32> to vector<1x8x1xf32>
    %20 = arith.truncf %17 : vector<1x8x8xf32> to vector<1x8x8xbf16>
    %21 = arith.truncf %7 : vector<1x8x128xf32> to vector<1x8x128xbf16>
    %cst_13 = arith.constant dense<0.000000e+00> : vector<1x8x128xf32>
    %22 = tpu.matmul %20, %21, %cst_13 {dimension_numbers = #tpu.dot_dimension_numbers<[2], [1], [1], [2], [0, 0, 0, 1, 1, 2], [0], [0]>} : vector<1x8x8xbf16>, vector<1x8x128xbf16>, vector<1x8x128xf32> -> vector<1x8x128xf32>
    %23 = vector.broadcast %14 : vector<1x8x1xf32> to vector<1x8x4xf32>
    %24 = arith.subf %11, %23 : vector<1x8x4xf32>
    %25 = math.exp %24 : vector<1x8x4xf32>
    %cst_14 = arith.constant dense<0.000000e+00> : vector<1x8xf32>
    %26 = vector.multi_reduction <add>, %25, %cst_14 [2] : vector<1x8x4xf32> to vector<1x8xf32>
    %27 = vector.shape_cast %26 : vector<1x8xf32> to vector<1x8x1xf32>
    %28 = arith.addf %19, %27 : vector<1x8x1xf32>
    %cst_15 = arith.constant dense<0.000000e+00> : vector<1x8x128xf32>
    %29 = tpu.matmul %25, %3, %cst_15 {dimension_numbers = #tpu.dot_dimension_numbers<[2], [0], [0, 1], [1], [0, 0, 0, 1, 1, 1], [], []>} : vector<1x8x4xf32>, vector<4x128xf32>, vector<1x8x128xf32> -> vector<1x8x128xf32>
    %30 = arith.addf %22, %29 : vector<1x8x128xf32>
    %cst_16 = arith.constant 1.000000e+00 : f32
    %31 = vector.broadcast %cst_16 : f32 to vector<1x8x1xf32>
    %32 = arith.divf %31, %28 : vector<1x8x1xf32>
    %33 = vector.broadcast %32 : vector<1x8x1xf32> to vector<1x8x128xf32>
    %34 = arith.mulf %30, %33 : vector<1x8x128xf32>
    %c0_17 = arith.constant 0 : index
    %c0_18 = arith.constant 0 : index
    %c0_19 = arith.constant 0 : index
    %35 = vector.load %arg5[%c0_17, %c0_18, %c0_19] : memref<1x8x128xf32, #tpu.memory_space<vmem>>, vector<1x8x128xf32>
    tpu.vector_store %arg5[%c0_17, %c0_18, %c0_19], %34 {strides = array<i32>} : memref<1x8x128xf32, #tpu.memory_space<vmem>>, vector<1x8x128xf32>,
    return
  }
  func.func @transform_0(%arg0: i32) -> (i32, i32, i32) {
    %c0_i32 = arith.constant 0 : i32
    %c0_i32_0 = arith.constant 0 : i32
    %c0_i32_1 = arith.constant 0 : i32
    return %arg0, %c0_i32, %c0_i32_0 : i32, i32, i32
  }
  func.func @transform_1(%arg0: i32) -> (i32, i32) {
    %c0_i32 = arith.constant 0 : i32
    %c0_i32_0 = arith.constant 0 : i32
    %c0_i32_1 = arith.constant 0 : i32
    return %c0_i32, %c0_i32_0 : i32, i32
  }
  func.func @transform_2(%arg0: i32) -> (i32, i32) {
    %c0_i32 = arith.constant 0 : i32
    %c0_i32_0 = arith.constant 0 : i32
    %c0_i32_1 = arith.constant 0 : i32
    return %c0_i32, %c0_i32_0 : i32, i32
  }
  func.func @transform_3(%arg0: i32) -> (i32, i32) {
    %c0_i32 = arith.constant 0 : i32
    %c0_i32_0 = arith.constant 0 : i32
    %c0_i32_1 = arith.constant 0 : i32
    return %c0_i32, %c0_i32_0 : i32, i32
  }
  func.func @transform_4(%arg0: i32) -> (i32, i32, i32) {
    %c0_i32 = arith.constant 0 : i32
    %c0_i32_0 = arith.constant 0 : i32
    %c0_i32_1 = arith.constant 0 : i32
    return %arg0, %c0_i32, %c0_i32_0 : i32, i32, i32
  }
}

</mosaic_0001>

<bundles_post_ra>
// kernel: self_attention_head.1
= control target key start
LH: loop header
LB: loop body
LE: loop exit
PB: predicated region body
PF: predicated region fallthrough
CT: control target
= control target key end

     0   :  { %9 = vsyncpa [#allocation3], 0  ;;  %s795_s0 = inlined_call_operand.vmem [shape: bf16[2,8,32], index: 0, kind: input, shape index: {}]   ;;  %s796_s1 = inlined_call_operand.vmem [shape: bf16[32,384], index: 1, kind: input, shape index: {}]   ;;  %s797_s2 = inlined_call_operand.vmem [shape: f32[4,128], index: 2, kind: input, shape index: {}]   ;;  %s798_s3 = inlined_call_operand.vmem [shape: f32[4,128], index: 3, kind: input, shape index: {}]   ;;  %s799_s4 = inlined_call_operand.hbm [shape: f32[2,8,128], index: 4, kind: output, shape index: {}]  }
   0x1   :  { %11 = vsyncpa [#allocation3 + $0x1], 0  ;;  %s662_s15 = smov 0   ;;  %s664_s16 = smov 0  }
   0x2   :  { %s666_s17 = smov 0   ;;  %s668_s18 = smov 0  }
   0x3 LB: > { %s683_s19 = sadd.s32 4294967295, %s635_s18   ;;  %s482_s20 = sadd.s32 4294967294, %s635_s18   ;;  %s635_s18 = sphi %s668_s18, %s805_s18   ;;  %s631_s17 = sphi %s666_s17, %s804_s17   ;;  %s627_s16 = sphi %s664_s16, %s803_s16   ;;  %s623_s15 = sphi %s662_s15, %s802_s15  }
   0x4   : > { %s687_s21 = sadd.s32 1, %s635_s18   ;;  %s113_s22 = sadd.s32 1, %s631_s17 }
   0x5   : > { %s110_s23 = ssub.s32 %s635_s18, %s687_s21  ;;  %p123_p0 = scmp.ne.s32.totalorder %s631_s17, %s627_s16 }
   0x6   : > { %p111_p1 = scmp.eq.s32.totalorder %s110_s23, 0  ;;  %p124_p2 = scmp.eq.s32.totalorder %s683_s19, 1 }
   0x7   : > { %p129_p3 = scmp.ne.s32.totalorder %s627_s16, %s623_s15  ;;  %p130_p4 = scmp.eq.s32.totalorder %s482_s20, 1 }
   0x8   : > { %s698_s24 = scalar_select %p111_p1, %s631_s17, %s113_s22  }
   0x9   : > { %p700_p5 = por %p124_p2, %p123_p0  ;;  %p704_p6 = por %p130_p4, %p129_p3 }
   0xa   : > { %p485_p7 = scmp.ge.s32.totalorder %s635_s18, 1  ;;  %p164_p8 = scmp.lt.s32.totalorder %s635_s18, 3 }
   0xc   : > { %p165_p9 = pnand %p485_p7, %p164_p8 }
   0xd   : > { %p189_p10 = scmp.lt.s32.totalorder (!%p165_p9), %s683_s19, 1  ;;  %s519_s28 = sshll.u32 (!%p165_p9), %s683_s19, 3 }
   0xe   : > { %168 = sbr.rel (%p165_p9) target bundleno = 578 (0x242), region = 36  ;;  %s418_s5 = scalar_lea.hbm (!%p165_p9), %s799_s4, %s519_s28 }
   0xf   : > { %s422_s8 = sshll.u32 (!%p165_p9), %s418_s5, 4  ;;  %s593_s13 = scalar_lea.hbm (!%p165_p9), %s799_s4, 16  ;;  %s423_s8 = int_to_ptr.hbm [resolvable:$true] %s422_s8 }
  0x10   : > { %s587_s9 = sshra.s32 (!%p165_p9), %s423_s8, 4  ;;  %s588_s9 = int_to_ptr.hbm [resolvable:$true] %s587_s9 }
  0x11   : > { %s589_s10 = scalar_lea.hbm (!%p165_p9), %s588_s9, 8  ;;  %p594_p0 = scmp.lt.s32.totalorder (!%p165_p9), %s588_s9, %s799_s4 }
  0x12   : > { %p590_p11 = scmp.ne.s32.totalorder (!%p165_p9), %s588_s9, %s589_s10  ;;  %p595_p1 = scmp.lt.s32.totalorder (!%p165_p9), %s593_s13, %s589_s10 }
  0x13   : > { %v502_v0 = vld [vmem:[%s796_s1 + $0x18] sm:$0xf]  ;;  %v526_v1 = vld [vmem:[%s796_s1 + $0x20] sm:$0xf0]  ;;  %v525_v2 = vld [vmem:[%s796_s1 + $0x1c] sm:$0xf] }
  0x14   : > { %v503_v3 = vor.u32 %v526_v1, %v502_v0  ;;  %v504_v4 = vld [vmem:[%s796_s1 + $0x24] sm:$0xf0]  ;;  %v490_v5 = vld [vmem:[%s796_s1] sm:$0xf]  ;;  %v523_v6 = vld [vmem:[%s796_s1 + $0x8] sm:$0xf0]  ;;  %p591_p12 = pnand %p590_p11, %p700_p5  ;;  %p596_p2 = por %p595_p1, %p594_p0 }
  0x15   : > { %v507_v7 = vor.u32 %v525_v2, %v504_v4  ;;  %v522_v8 = vld [vmem:[%s796_s1 + $0x4] sm:$0xf]  ;;  %v492_v9 = vld [vmem:[%s796_s1 + $0xc] sm:$0xf0]  ;;  %v491_v10 = vor.u32 %v523_v6, %v490_v5  ;;  %s190_s23 = scalar_select %p189_p10, %s683_s19, 1  ;;  %vm237_vm0 = vcmask 261120  }
  0x16   : > { %247 = vmatpush.bf16.msra.mxu0 %v503_v3  ;;  %v495_v11 = vor.u32 %v522_v8, %v492_v9  ;;  %v510_v13 = vld [vmem:[%s796_s1 + $0x20] sm:$0xf]  ;;  %v527_v14 = vld [vmem:[%s796_s1 + $0x28] sm:$0xf0]  ;;  %v498_v15 = vld [vmem:[%s796_s1 + $0x8] sm:$0xf]  ;;  %p592_p13 = pneg %p591_p12 }
  0x17   : > { %260 = vmatpush.bf16.msra.mxu1 %v507_v7  ;;  %s487_s27 = sshll.u32 %s190_s23, 2  ;;  %v511_v16 = vor.u32 %v527_v14, %v510_v13  ;;  %v524_v17 = vld [vmem:[%s796_s1 + $0x10] sm:$0xf0]  ;;  %v203_v20 = vld [vmem:[%s797_s2] sm:$0xf]  ;;  %vm300_vm1 = vcmask 64512  }
  0x18   : > { %s192_s30 = scalar_lea.vmem %s795_s0, %s487_s27  ;;  %v499_v18 = vor.u32 %v524_v17, %v498_v15  ;;  %vm324_vm2 = vcmask 31744   ;;  %vm347_vm3 = vcmask 1043456   ;;  %v204_v31 = vld [vmem:[%s798_s3] sm:$0xf]  ;;  %s186_s23 = sand.u32 1, %s627_s16  }
  0x19   : > { %v194_v12 = vld [vmem:[%s192_s30] sm:$0xf]  ;;  %273 = vmatpush.bf16.msra.mxu2 %v511_v16  ;;  %s486_s27 = sshll.u32 %s186_s23, 3  ;;  %s408_s19 = scalar_lea.sflag [#allocation3], %s186_s23 }
  0x1a   : > { %248 = vmatpush.bf16.msra.mxu0 %v491_v10  ;;  %s188_s6 = scalar_lea.vmem [#allocation2], %s486_s27  ;;  %p597_p3 = pnand %p596_p2, %p592_p13 }
  0x1b   : > { %261 = vmatpush.bf16.msra.mxu1 %v495_v11  ;;  %s420_s7 = sshll.u32 %s188_s6, 4  ;;  %s421_s7 = int_to_ptr.vmem [resolvable:$true] %s420_s7 }
  0x1d   : > { %512 = vmatmul.msk.bf16.vlgmr.msra.gmra.mxu0 %vm237_vm0, %v194_v12  ;;  %274 = vmatpush.bf16.msra.mxu2 %v499_v18 }
  0x1e   : > { %513 = vmatmul.msk.bf16.vlgmr.msra.gmra.mxu1 %vm237_vm0, %v194_v12 }
  0x20   : > { %514 = vmatmul.msk.bf16.vlgmr.msra.gmra.mxu2 %vm237_vm0, %v194_v12 }
  0x9a   : > { %v250_v19 = vpop.f32.mrf.mxu0 }
  0x9b   : > { %v263_v21 = vpop.f32.mrf.mxu1 }
  0x9c   : > { %295 = vmatpush.xpose.msra.mxu3 %v263_v21 }
  0x9f   : > { %296 = vmatmul.f32.vlgmr.msra.gmra.mxu3 %v250_v19 }
  0xa0   : > { %319 = vmatpush.xpose.msrb.mxu3 %v203_v20 }
  0xa2   : > { %v252_v22 = vpop.f32.mrf.mxu0 }
  0xa3   : > { %v265_v23 = vpop.f32.mrf.mxu1  ;;  %v276_v28 = vpop.f32.mrf.mxu2 }
  0xa4   : > { %v336_v30 = vpack.c.bf16 %v276_v28, %v276_v28  ;;  %515 = vmatpush.msk.msra.mxu3 %vm347_vm3, %v204_v31 }
  0xa6   : > { %v375_v32 = vsel %vm347_vm3, %v336_v30, 0 }
  0xa7   : > { %320 = vmatmul.f32.vlgmr.msrb.gmra.mxu3 %v250_v19  ;;  %384 = vmatpush.bf16.msrb.mxu0 %v375_v32 }
  0xab   : > { %v278_v29 = vpop.f32.mrf.mxu2 }
 0x122   : > { %v297_v24 = vpop.f32.mrf.mxu3 }
 0x123   : > { %v301_v25 = vsel %vm300_vm1, %v297_v24, -inf }
 0x124   : > { %302 = vmax.xlane.f32.xlu0 %v301_v25 }
 0x12a   : > { %v321_v26 = vpop.f32.mrf.mxu3 }
 0x12b   : > { %v325_v27 = vsel %vm324_vm2, %v321_v26, -inf }
 0x12c   : > { %326 = vmax.xlane.f32.xlu0 %v325_v27 }
 0x197   : > { %v303_v33 = vpop.xlane.xlu0 %302 }
 0x19f   : > { %v327_v34 = vpop.xlane.xlu0 %326 }
 0x1a0   : > { %v328_v35 = vmax.f32 %v303_v33, %v327_v34 }
 0x1a2   : > { %v329_v36 = vsub.f32 %v297_v24, %v328_v35  ;;  %v337_v37 = vsub.f32 %v321_v26, %v328_v35 }
 0x1a4   : > { %v330_v38 = vmul.f32 1.442695, %v329_v36  ;;  %v338_v39 = vmul.f32 1.442695, %v337_v37 }
 0x1a6   : > { %567 = vpow2.f32 %v330_v38 }
 0x1a7   : > { %569 = vpow2.f32 %v338_v39 }
 0x1ac   : > { %v568_v40 = vpop.eup %567 }
 0x1ad   : > { %v570_v41 = vpop.eup %569  ;;  %v332_v42 = vsel %vm300_vm1, %v568_v40, 0.0  ;;  %v335_v43 = vpack.c.bf16 %v568_v40, %v568_v40 }
 0x1ae   : > { %516 = vmatmul.msk.f32.vlgmr.msra.gmra.mxu3 %vm324_vm2, %v570_v41  ;;  %333 = vadd.xlane.f32.xlu1 %v332_v42  ;;  %v340_v44 = vsel %vm324_vm2, %v570_v41, 0.0 }
 0x1af   : > { %517 = vmatmul.msk.bf16.vlgmr.msrb.gmra.mxu0 %vm300_vm1, %v335_v43 }
 0x1b6   : > { %341 = vadd.xlane.f32.xlu1 %v340_v44 }
 0x221   : > { %v334_v45 = vpop.xlane.xlu1 %333 }
 0x229   : > { %v342_v46 = vpop.xlane.xlu1 %341 }
 0x22a   : > { %v343_v47 = vadd.f32 %v342_v46, %v334_v45 }
 0x22c   : > { %571 = vrcp.f32 %v343_v47  ;;  %v386_v48 = vpop.f32.mrf.mxu0  ;;  %v401_v53 = vand.u32 2147483648, %v343_v47  ;;  %v399_v55 = vand.u32 2147483647, %v343_v47  ;;  %vm395_vm5 = vweird.f32 %v343_v47 }
 0x22e   : > { %v402_v58 = vor.u32 1.1754944e-38, %v401_v53  ;;  %vm400_vm7 = vcmp.eq.f32.partialorder %v399_v55, 8.507059e+37 }
 0x231   : > { %v368_v56 = vpop.f32.mrf.mxu3 }
 0x232   : > { %v572_v49 = vpop.eup %571  ;;  %v387_v59 = vadd.f32 %v386_v48, %v368_v56 }
 0x233   : > { %v391_v50 = vmul.f32 %v572_v49, %v343_v47  ;;  %vm396_vm4 = vweird.f32 %v572_v49 }
 0x234   : > { %v388_v51 = vpop.f32.mrf.mxu0  ;;  %vm397_vm6 = vmor %vm395_vm5, %vm396_vm4 }
 0x235   : > { %v392_v52 = vsub.f32 1.0, %v391_v50 }
 0x237   : > { %v393_v54 = vmul.f32 %v572_v49, %v392_v52 }
 0x239   : > { %v394_v57 = vadd.f32 %v572_v49, %v393_v54 }
 0x23b   : > { %v398_v60 = vsel %vm397_vm6, %v572_v49, %v394_v57 }
 0x23c   : > { %v403_v61 = vsel %vm400_vm7, %v402_v58, %v398_v60 }
 0x23d   : > { %v405_v62 = vmul.f32 %v403_v61, %v387_v59 }
 0x23f   : > { %406 = vst [vmem:[%s188_s6] sm:$0xff] %v405_v62 }
 0x240   : > { %600 = shalt.err (!%p597_p3)
}
 0x241   : > { %528 = dma.vmem_to_hbm [thread:$0]  (%p700_p5), %s421_s7, 128, %s423_s8, %s408_s19  }
 0x242 PF: > { %p534_p4 = scmp.ge.s32.totalorder %s635_s18, 2  ;;  %s434_s22 = sand.u32 1, %s623_s15  }
 0x243   : > { %s435_s23 = scalar_lea.sflag [#allocation3], %s434_s22 }
 0x244   : > { %p531_p7 = pnand %p534_p4, %p704_p6 }
 0x246   : > { %p532_p8 = pneg %p531_p7 }
 0x248   : > { %618 = dma.done.wait (%p532_p8), %s435_s23, 128  }
 0x249   : > { %620 = vsyncadd (%p532_p8), %s435_s23, 4294967168  ;;  %p14_p9 = scmp.ge.s32.totalorder %s687_s21, 4   ;;  %s802_s15 = smov %s627_s16 }
 0x24a   : > { %s803_s16 = smov %s631_s17  ;;  %s804_s17 = smov %s698_s24 }
 0x24b   : > { %s805_s18 = smov %s687_s21  ;;  %16 = sbr.rel (!%p14_p9) target bundleno = 3 (0x3), region = 71 }
 0x250   :  { %441 = vsyncpa [#allocation3], 1 }
 0x251   :  { %443 = vsyncpa [#allocation3 + $0x1], 1 }

</bundles_post_ra>
